<compile_context>
chip_gen: v6e
topology: v6e:2x2x1
jax: 0.10.0
libtpu: 0.0.40
codegen_flags: <defaults>
</compile_context>

<pallas_src>
import functools
import math

import jax
import jax.numpy as jnp
from jax.experimental import pallas as pl
from jax.experimental.pallas import tpu as pltpu

_INV_LN10 = 1.0 / math.log(10.0)

_TARGET_STEP_BYTES = 4 * 1024 * 1024   # ~2-8 MiB/step ≈ 85% of HBM roofline
_MIN_STEP_BYTES = 1 * 1024 * 1024      # never shrink per-step DMA below this


def _cdiv(a, b):
    return -(-a // b)


def _round_up(x, m):
    return ((x + m - 1) // m) * m


def _tpu_generation_info():
    """Return (multi_core_tc, pipeline_budget_bytes, vmem_limit_bytes)."""
    kind = ""
    try:
        kind = jax.devices()[0].device_kind.lower()
    except Exception:
        pass
    is_v7 = "v7" in kind

    vmem_cap = None
    try:
        vmem_cap = int(pltpu.get_tpu_info().vmem_capacity_bytes)
    except Exception:
        vmem_cap = None
    if vmem_cap is None:
        # Heuristic fallback from device_kind; conservative when unknown.
        vmem_cap = (128 << 20) if ("v5" in kind or "v6" in kind) else (64 << 20)

    if (not is_v7) and vmem_cap >= (96 << 20):
        # v5e / v6e: 128 MiB VMEM, single TensorCore — bigger pipeline is free.
        return False, 48 << 20, 96 << 20
    # v7x (64 MiB per TensorCore) or unknown hardware: stay conservative.
    return is_v7, 24 << 20, 48 << 20


def _semantics_candidates(multi_core, n_axes):
    """Dimension-semantics tuples to try for the (row[, reduction]) grid."""
    tail = ("arbitrary",) * (n_axes - 1)
    cands = []
    if multi_core:
        core_par = getattr(pltpu, "CORE_PARALLEL", None)
        if core_par is not None:
            cands.append((core_par,) + tail)   # actually shards across v7x TCs
    cands.append(("parallel",) + tail)
    return cands


def _run_pallas(build_call, sem_candidates):
    """Try dimension-semantics candidates in order; fall back on failure."""
    last_exc = None
    for sems in sem_candidates:
        try:
            out = build_call(sems)
            if len(sem_candidates) > 1:
                jax.block_until_ready(out)     # surface compile/runtime errors
            return out
        except Exception as exc:               # pragma: no cover - safety net
            last_exc = exc
    raise last_exc


def _finalize(signal_pow, noise_pow, eps, negative, upper_bound, out_dtype):
    ratio = (signal_pow + eps) / (noise_pow + eps)
    snr = 10.0 * (jnp.log(ratio) * _INV_LN10)          # 10 * log10(ratio)
    if negative:
        snr = -snr
    if upper_bound is not None:
        snr = jnp.minimum(snr, jnp.float32(upper_bound))
    return snr.astype(out_dtype)


# ---------------------------------------------------------------------------
# Kernel 1: whole reduction axis resident per block (common case).
# ---------------------------------------------------------------------------
def _snr_kernel_full_l(pred_ref, gt_ref, out_ref, *, eps, negative, upper_bound):
    g = gt_ref[...].astype(jnp.float32)
    p = pred_ref[...].astype(jnp.float32)
    n = g - p
    signal_pow = jnp.sum(g * g, axis=-1, keepdims=True)   # (tb, 1)
    noise_pow = jnp.sum(n * n, axis=-1, keepdims=True)    # (tb, 1)
    out_ref[...] = _finalize(signal_pow, noise_pow, eps, negative, upper_bound,
                             out_ref.dtype)


# ---------------------------------------------------------------------------
# Kernel 2: reduction axis tiled (for very long signals) — accumulator pattern.
# ---------------------------------------------------------------------------
def _snr_kernel_tiled_l(pred_ref, gt_ref, out_ref, sig_acc, noi_acc, *,
                        eps, negative, upper_bound, l_total, l_tile):
    k = pl.program_id(1)
    n_l = pl.num_programs(1)

    @pl.when(k == 0)
    def _():
        sig_acc[...] = jnp.zeros_like(sig_acc)
        noi_acc[...] = jnp.zeros_like(noi_acc)

    def _accumulate(g, p):
        n = g - p
        sig_acc[...] += jnp.sum(g * g, axis=-1, keepdims=True)
        noi_acc[...] += jnp.sum(n * n, axis=-1, keepdims=True)

    if l_total % l_tile != 0:
        # Ragged last L tile: mask only on the final step (cold path is skipped
        # at runtime by pl.when; every earlier step runs the plain accumulate).
        @pl.when(k < n_l - 1)
        def _():
            _accumulate(gt_ref[...].astype(jnp.float32),
                        pred_ref[...].astype(jnp.float32))

        @pl.when(k == n_l - 1)
        def _():
            g = gt_ref[...].astype(jnp.float32)
            p = pred_ref[...].astype(jnp.float32)
            col = jax.lax.broadcasted_iota(jnp.int32, g.shape, dimension=1)
            valid = (k * l_tile + col) < l_total
            g = jnp.where(valid, g, 0.0)
            p = jnp.where(valid, p, 0.0)
            _accumulate(g, p)
    else:
        _accumulate(gt_ref[...].astype(jnp.float32),
                    pred_ref[...].astype(jnp.float32))

    @pl.when(k == n_l - 1)
    def _():
        out_ref[...] = _finalize(sig_acc[...], noi_acc[...], eps, negative,
                                 upper_bound, out_ref.dtype)


# ---------------------------------------------------------------------------
# Row-tile policy: bytes-based (HBM roofline), VMEM-budget clamped.
# ---------------------------------------------------------------------------
def _pick_row_tile(B, l_block, itemsize, row_tile, pipeline_budget, multi_core):
    bytes_per_row = 2 * l_block * itemsize           # both inputs, one buffer each
    # VMEM ceiling for the double-buffered input pipeline (2 inputs x 2 bufs).
    tb_vmem_cap = max(8, (pipeline_budget // (2 * bytes_per_row)) // 8 * 8)

    if B < 8:
        return B                                     # full-dim block always legal

    if row_tile is not None:
        tb = max(8, (int(row_tile) // 8) * 8)
        tb = min(tb, tb_vmem_cap)                    # clamp user tile to the budget
        return max(8, min(tb, (B // 8) * 8))

    # Bytes-based target: ~_TARGET_STEP_BYTES of input read per grid step.
    tb = max(8, (_TARGET_STEP_BYTES // bytes_per_row) // 8 * 8)
    tb = min(tb, tb_vmem_cap)

    if multi_core:
        # v7x: aim for >= 4 row blocks (2 per TensorCore), but never drop the
        # per-step input bytes below ~1 MiB to do so.
        tb_four_steps = max(8, _round_up(_cdiv(B, 4), 8))
        tb_min_bytes = max(8, (_MIN_STEP_BYTES // bytes_per_row) // 8 * 8)
        tb = min(tb, max(tb_four_steps, tb_min_bytes))

    return max(8, min(tb, (B // 8) * 8))


# ---------------------------------------------------------------------------
# Wrapper
# ---------------------------------------------------------------------------
def snr_loss(pred, gt, *, upper_bound=None, negative=True,
             row_tile=None, l_tile=None, vmem_tile_budget_bytes=None):
    """Pallas implementation of the Snr module's forward pass."""
    assert pred.shape == gt.shape, "pred and gt must have identical shapes"
    *lead, L = pred.shape
    out_shape_final = tuple(lead)

    B = 1
    for d in lead:
        B *= d
    if B == 0:
        return jnp.zeros(out_shape_final, jnp.float32)

    in_dtype = jnp.dtype(pred.dtype)
    if jnp.issubdtype(in_dtype, jnp.floating):
        eps = float(jnp.finfo(in_dtype).eps)     # matches torchmetrics
    else:
        eps = float(jnp.finfo(jnp.float32).eps)
    itemsize = in_dtype.itemsize

    multi_core, pipeline_budget, vmem_limit = _tpu_generation_info()
    if vmem_tile_budget_bytes is not None:
        pipeline_budget = int(vmem_tile_budget_bytes)

    # Flatten leading dims into rows (no padding, no extra HBM copies).
    pred2 = pred.reshape(B, L)
    gt2 = gt.reshape(B, L)

    # per-row pipeline bytes: 2 inputs x 2 pipeline buffers x row x itemsize
    per_row_full_l = 4 * L * itemsize
    use_l_tiling = (l_tile is not None) or (per_row_full_l * 8 > pipeline_budget)

    if not use_l_tiling:
        tb = _pick_row_tile(B, L, itemsize, row_tile, pipeline_budget, multi_core)
        grid_rows = _cdiv(B, tb)
        kernel = functools.partial(_snr_kernel_full_l, eps=eps, negative=negative,
                                   upper_bound=upper_bound)

        def build_call(sems):
            return pl.pallas_call(
                kernel,
                out_shape=jax.ShapeDtypeStruct((B, 1), jnp.float32),
                grid_spec=pltpu.PrefetchScalarGridSpec(
                    num_scalar_prefetch=0,
                    grid=(grid_rows,),
                    in_specs=[
                        pl.BlockSpec((tb, L), lambda i: (i, 0)),
                        pl.BlockSpec((tb, L), lambda i: (i, 0)),
                    ],
                    out_specs=pl.BlockSpec((tb, 1), lambda i: (i, 0)),
                ),
                compiler_params=pltpu.CompilerParams(
                    dimension_semantics=sems,
                    vmem_limit_bytes=vmem_limit),
            )(pred2, gt2)

        out2 = _run_pallas(build_call, _semantics_candidates(multi_core, 1))
    else:
        # Reduction-tiled path: decouples the row tile from L for huge signals.
        tl = int(l_tile) if l_tile is not None else 512
        tl = (max(tl, 128) // 128) * 128              # lane-aligned
        if tl >= L:
            tl = L                                    # single L step (full dim)
        tb = _pick_row_tile(B, tl, itemsize, row_tile, pipeline_budget, multi_core)
        grid_rows = _cdiv(B, tb)
        grid_l = _cdiv(L, tl)
        kernel = functools.partial(_snr_kernel_tiled_l, eps=eps, negative=negative,
                                   upper_bound=upper_bound, l_total=L, l_tile=tl)

        def build_call(sems):
            return pl.pallas_call(
                kernel,
                out_shape=jax.ShapeDtypeStruct((B, 1), jnp.float32),
                grid_spec=pltpu.PrefetchScalarGridSpec(
                    num_scalar_prefetch=0,
                    grid=(grid_rows, grid_l),
                    in_specs=[
                        pl.BlockSpec((tb, tl), lambda i, k: (i, k)),
                        pl.BlockSpec((tb, tl), lambda i, k: (i, k)),
                    ],
                    out_specs=pl.BlockSpec((tb, 1), lambda i, k: (i, 0)),
                    scratch_shapes=[
                        pltpu.VMEM((tb, 1), jnp.float32),
                        pltpu.VMEM((tb, 1), jnp.float32),
                    ],
                ),
                compiler_params=pltpu.CompilerParams(
                    dimension_semantics=sems,
                    vmem_limit_bytes=vmem_limit),
            )(pred2, gt2)

        out2 = _run_pallas(build_call, _semantics_candidates(multi_core, 2))

    return out2[:, 0].reshape(out_shape_final)


# ---------------------------------------------------------------------------
# Plain-JAX reference for correctness checking.
# ---------------------------------------------------------------------------
def _snr_ref(pred, gt, *, upper_bound=None, negative=True):
    eps = float(jnp.finfo(pred.dtype).eps) if jnp.issubdtype(
        jnp.dtype(pred.dtype), jnp.floating) else float(jnp.finfo(jnp.float32).eps)
    p = pred.astype(jnp.float32)
    g = gt.astype(jnp.float32)
    noise = g - p
    ratio = (jnp.sum(g * g, -1) + eps) / (jnp.sum(noise * noise, -1) + eps)
    snr = 10.0 * jnp.log10(ratio)
    if negative:
        snr = -snr
    if upper_bound is not None:
        snr = jnp.minimum(snr, upper_bound)
    return snr


if __name__ == "__main__":
    key = jax.random.PRNGKey(0)
    k1, k2, k3, k4, k5, k6 = jax.random.split(key, 6)
    upper_bound = 30.0

    # Test 1: common full-L path, (batch=2, channels=4, samples=256) -> (2, 4).
    pred1 = jax.random.normal(k1, (2, 4, 256), dtype=jnp.float32)
    gt1 = pred1 + 0.1 * jax.random.normal(k2, (2, 4, 256), dtype=jnp.float32)
    out1 = jax.block_until_ready(
        snr_loss(pred1, gt1, upper_bound=upper_bound, negative=True))
    ref1 = _snr_ref(pred1, gt1, upper_bound=upper_bound, negative=True)
    assert out1.shape == (2, 4), out1.shape
    assert jnp.allclose(out1, ref1, atol=1e-4, rtol=1e-4), (out1, ref1)

    # Test 2: L-tiled accumulator path with a ragged last L tile (L=200, tl=128).
    pred2 = jax.random.normal(k3, (2, 8, 200), dtype=jnp.float32)
    gt2 = pred2 + 0.25 * jax.random.normal(k4, (2, 8, 200), dtype=jnp.float32)
    out2 = jax.block_until_ready(
        snr_loss(pred2, gt2, upper_bound=None, negative=True, l_tile=128))
    ref2 = _snr_ref(pred2, gt2, upper_bound=None, negative=True)
    assert out2.shape == (2, 8), out2.shape
    assert jnp.allclose(out2, ref2, atol=1e-4, rtol=1e-4), (out2, ref2)

    # Test 3: ragged row count (B=15 not a multiple of the row tile) — no padding.
    pred3 = jax.random.normal(k5, (3, 5, 256), dtype=jnp.float32)
    gt3 = pred3 + 0.05 * jax.random.normal(k6, (3, 5, 256), dtype=jnp.float32)
    out3 = jax.block_until_ready(
        snr_loss(pred3, gt3, upper_bound=upper_bound, negative=True))
    ref3 = _snr_ref(pred3, gt3, upper_bound=upper_bound, negative=True)
    assert out3.shape == (3, 5), out3.shape
    assert jnp.allclose(out3, ref3, atol=1e-4, rtol=1e-4), (out3, ref3)

    # Test 4: bf16 inputs passed through at native dtype (in-kernel f32 compute).
    pred4 = pred1.astype(jnp.bfloat16)
    gt4 = gt1.astype(jnp.bfloat16)
    out4 = jax.block_until_ready(
        snr_loss(pred4, gt4, upper_bound=upper_bound, negative=True))
    ref4 = _snr_ref(pred4, gt4, upper_bound=upper_bound, negative=True)
    assert out4.shape == (2, 4), out4.shape
    assert jnp.allclose(out4, ref4, atol=1e-3, rtol=1e-3), (out4, ref4)

    # Test 5: oversized user row_tile gets clamped to the VMEM budget (no crash).
    out5 = jax.block_until_ready(
        snr_loss(pred3, gt3, upper_bound=upper_bound, negative=True,
                 row_tile=1_000_000))
    assert jnp.allclose(out5, ref3, atol=1e-4, rtol=1e-4), (out5, ref3)

    print("KERNEL_OK")
</pallas_src>

<mosaic_0001>
module attributes {stable_mosaic.version = 11 : i64} {
  func.func @_snr_kernel_full_l(%arg0: i32, %arg1: memref<8x256xf32, #tpu.memory_space<vmem>>, %arg2: memref<8x256xf32, #tpu.memory_space<vmem>>, %arg3: memref<8x1xf32, #tpu.memory_space<vmem>>) attributes {dimension_semantics = [#tpu.dimension_semantics<parallel>], iteration_bounds = array<i64: 1>, scalar_prefetch = 0 : i64, scratch_operands = 0 : i64, tpu.core_type = #tpu.core_type<tc>, window_params = [{transform_indices = @transform_0, window_bounds = array<i64: 8, 256>}, {transform_indices = @transform_1, window_bounds = array<i64: 8, 256>}, {transform_indices = @transform_2, window_bounds = array<i64: 8, 1>}]} {
    %c0 = arith.constant 0 : index
    %c0_0 = arith.constant 0 : index
    %0 = vector.load %arg2[%c0, %c0_0] : memref<8x256xf32, #tpu.memory_space<vmem>>, vector<8x256xf32>
    %c0_1 = arith.constant 0 : index
    %c0_2 = arith.constant 0 : index
    %1 = vector.load %arg1[%c0_1, %c0_2] : memref<8x256xf32, #tpu.memory_space<vmem>>, vector<8x256xf32>
    %2 = arith.subf %0, %1 : vector<8x256xf32>
    %3 = arith.mulf %0, %0 : vector<8x256xf32>
    %cst = arith.constant dense<0.000000e+00> : vector<8xf32>
    %4 = vector.multi_reduction <add>, %3, %cst [1] : vector<8x256xf32> to vector<8xf32>
    %5 = vector.shape_cast %4 : vector<8xf32> to vector<8x1xf32>
    %6 = arith.mulf %2, %2 : vector<8x256xf32>
    %cst_3 = arith.constant dense<0.000000e+00> : vector<8xf32>
    %7 = vector.multi_reduction <add>, %6, %cst_3 [1] : vector<8x256xf32> to vector<8xf32>
    %8 = vector.shape_cast %7 : vector<8xf32> to vector<8x1xf32>
    %cst_4 = arith.constant 1.1920929E-7 : f32
    %9 = vector.broadcast %cst_4 : f32 to vector<8x1xf32>
    %10 = arith.addf %5, %9 : vector<8x1xf32>
    %cst_5 = arith.constant 1.1920929E-7 : f32
    %11 = vector.broadcast %cst_5 : f32 to vector<8x1xf32>
    %12 = arith.addf %8, %11 : vector<8x1xf32>
    %13 = arith.divf %10, %12 : vector<8x1xf32>
    %14 = math.log %13 : vector<8x1xf32>
    %cst_6 = arith.constant 0.434294492 : f32
    %15 = vector.broadcast %cst_6 : f32 to vector<8x1xf32>
    %16 = arith.mulf %14, %15 : vector<8x1xf32>
    %cst_7 = arith.constant 1.000000e+01 : f32
    %17 = vector.broadcast %cst_7 : f32 to vector<8x1xf32>
    %18 = arith.mulf %17, %16 : vector<8x1xf32>
    %cst_8 = arith.constant 0.000000e+00 : f32
    %19 = vector.broadcast %cst_8 : f32 to vector<8x1xf32>
    %20 = arith.subf %19, %18 : vector<8x1xf32>
    %cst_9 = arith.constant 3.000000e+01 : f32
    %21 = vector.broadcast %cst_9 : f32 to vector<8x1xf32>
    %22 = arith.minimumf %20, %21 : vector<8x1xf32>
    %c0_10 = arith.constant 0 : index
    %c0_11 = arith.constant 0 : index
    %23 = vector.load %arg3[%c0_10, %c0_11] : memref<8x1xf32, #tpu.memory_space<vmem>>, vector<8x1xf32>
    tpu.vector_store %arg3[%c0_10, %c0_11], %22 {strides = array<i32>} : memref<8x1xf32, #tpu.memory_space<vmem>>, vector<8x1xf32>,
    return
  }
  func.func @transform_0(%arg0: i32) -> (i32, i32) {
    %c0_i32 = arith.constant 0 : i32
    %c0_i32_0 = arith.constant 0 : i32
    return %arg0, %c0_i32 : i32, i32
  }
  func.func @transform_1(%arg0: i32) -> (i32, i32) {
    %c0_i32 = arith.constant 0 : i32
    %c0_i32_0 = arith.constant 0 : i32
    return %arg0, %c0_i32 : i32, i32
  }
  func.func @transform_2(%arg0: i32) -> (i32, i32) {
    %c0_i32 = arith.constant 0 : i32
    %c0_i32_0 = arith.constant 0 : i32
    return %arg0, %c0_i32 : i32, i32
  }
}

</mosaic_0001>

<bundles_post_ra>
// kernel: tpu_custom_call.1
= control target key start
LH: loop header
LB: loop body
LE: loop exit
PB: predicated region body
PF: predicated region fallthrough
CT: control target
= control target key end

     0   :  { %7 = vsyncpa [#allocation3], 0  ;;  %s145_s0 = inlined_call_operand.hbm [shape: f32[8,256], index: 0, kind: input, shape index: {}]   ;;  %s146_s1 = inlined_call_operand.hbm [shape: f32[8,256], index: 1, kind: input, shape index: {}]   ;;  %s147_s2 = inlined_call_operand.vmem [shape: f32[8,1], index: 2, kind: output, shape index: {}]  }
   0x1   :  { %8 = vsyncpa [#allocation5], 0  ;;  %s119_s9 = smov [#allocation2]   ;;  %s120_s11 = smov [#allocation4]  }
   0x2   :  { %s15_s10 = sshll.u32 %s119_s9, 4  ;;  %s25_s12 = sshll.u32 %s120_s11, 4  ;;  %s16_s10 = int_to_ptr.vmem [resolvable:$true] %s15_s10  ;;  %s26_s12 = int_to_ptr.vmem [resolvable:$true] %s25_s12 }
   0x3   :  { %s83_s13 = scalar_lea.vmem %s16_s10, 256  ;;  %p88_p1 = scmp.lt.s32.totalorder %s16_s10, %s16_s10 }
   0x4   :  { %p84_p0 = scmp.ne.s32.totalorder %s16_s10, %s83_s13  ;;  %p89_p2 = scmp.lt.s32.totalorder %s83_s13, %s83_s13 }
   0x6   :  { %p90_p3 = por %p89_p2, %p88_p1 }
   0x8   :  { %p91_p4 = pnand %p90_p3, %p84_p0 }
   0xa   :  { %94 = shalt.err (!%p91_p4)
}
   0xb   :  { %18 = dma.hbm_to_vmem [thread:$0]  %s145_s0, 256, %s16_s10, [#allocation3]  }
   0xc   :  { %s103_s16 = scalar_lea.vmem %s26_s12, 256  ;;  %p108_p6 = scmp.lt.s32.totalorder %s26_s12, %s26_s12 }
   0xd   :  { %p104_p5 = scmp.ne.s32.totalorder %s26_s12, %s103_s16  ;;  %p109_p7 = scmp.lt.s32.totalorder %s103_s16, %s103_s16 }
   0xf   :  { %p110_p8 = por %p109_p7, %p108_p6 }
  0x11   :  { %p111_p9 = pnand %p110_p8, %p104_p5 }
  0x13   :  { %114 = shalt.err (!%p111_p9)
}
  0x14   :  { %28 = dma.hbm_to_vmem [thread:$0]  %s146_s1, 256, %s26_s12, [#allocation5]  }
  0x15   :  { %115 = dma.done.wait [#allocation3], 256  }
  0x16   :  { %116 = vsyncadd [#allocation3], 4294967040 }
  0x17   :  { %117 = dma.done.wait [#allocation5], 256  }
  0x18   :  { %118 = vsyncadd [#allocation5], 4294967040  ;;  %v35_v0 = vld [vmem:[#allocation4] sm:$0xff]  ;;  %v36_v1 = vld [vmem:[#allocation4 + $0x8] sm:$0xff]  ;;  %vm61_vm0 = vcmask 7168  }
  0x19   :  { %v37_v2 = vld [vmem:[#allocation2] sm:$0xff]  ;;  %v38_v3 = vld [vmem:[#allocation2 + $0x8] sm:$0xff]  ;;  %v41_v8 = vmul.f32 %v35_v0, %v35_v0  ;;  %v42_v9 = vmul.f32 %v36_v1, %v36_v1 }
  0x1a   :  { %v39_v4 = vsub.f32 %v35_v0, %v37_v2  ;;  %v40_v5 = vsub.f32 %v36_v1, %v38_v3 }
  0x1b   :  { %v43_v11 = vadd.f32 %v42_v9, %v41_v8 }
  0x1c   :  { %v46_v6 = vmul.f32 %v39_v4, %v39_v4  ;;  %v47_v7 = vmul.f32 %v40_v5, %v40_v5 }
  0x1e   :  { %v48_v10 = vadd.f32 %v47_v7, %v46_v6 }
  0x20   :  { %49 = vadd.xlane.f32.xlu0 %v48_v10 }
  0x24   :  { %44 = vadd.xlane.f32.xlu0 %v43_v11 }
  0xa9   :  { %v50_v12 = vpop.xlane.xlu0 %49 }
  0xaa   :  { %v52_v13 = vadd.f32 1.1920929e-07, %v50_v12 }
  0xac   :  { %71 = vrcp.f32 %v52_v13 }
  0xad   :  { %v45_v14 = vpop.xlane.xlu0 %44 }
  0xae   :  { %v51_v15 = vadd.f32 1.1920929e-07, %v45_v14 }
  0xb9   :  { %v72_v16 = vpop.eup %71 }
  0xba   :  { %v54_v17 = vmul.f32 %v72_v16, %v51_v15 }
  0xbc   :  { %73 = vlog2.f32 %v54_v17 }
  0xc9   :  { %v74_v18 = vpop.eup %73 }
  0xca   :  { %v56_v19 = vmul.f32 0.6931472, %v74_v18 }
  0xcc   :  { %v57_v20 = vmul.f32 0.4342945, %v56_v19 }
  0xce   :  { %v58_v21 = vmul.f32 10.0, %v57_v20 }
  0xd0   :  { %v59_v22 = vsub.f32 0.0, %v58_v21 }
  0xd2   :  { %v60_v23 = vmin.f32 %v59_v22, 30.0 }
  0xd4   :  { %62 = vst.msk [vmem:[%s147_s2] sm:$0xff] %vm61_vm0, %v60_v23 }
  0xd5   :  { %67 = vsyncpa [#allocation3], 1 }
  0xd6   :  { %68 = vsyncpa [#allocation5], 1 }

</bundles_post_ra>
